<compile_context>
chip_gen: v5e
topology: v5e:2x2
jax: 0.10.0
libtpu: 0.0.40
codegen_flags: <defaults>
</compile_context>

<pallas_src>
import jax
import jax.numpy as jnp
from jax.experimental import pallas as pl
from jax.experimental.pallas import tpu as pltpu


def _ego_pool_kernel(x_ref, w_enc_ref, b_enc_ref, w_a1_ref, b_a1_ref,
                     w_a2_ref, o_ref):
    # x_ref block: (Bt, C, HW); weights are full (tiny) arrays; o_ref: (Bt, hidden)
    x = x_ref[...]                                   # (Bt, C, HW) f32
    C = x.shape[1]
    hw = x.shape[2]

    w_enc = w_enc_ref[...]                           # (hidden, C)
    w_a1 = w_a1_ref[...]                             # (attn, C)

    # 1x1 convs over a tiny channel dim -> VPU broadcast-FMA outer products.
    enc = b_enc_ref[...][None]                       # (1, hidden, 1)
    a1 = b_a1_ref[...][None]                         # (1, attn, 1)
    for c in range(C):                               # C is tiny; unrolled at trace time
        xc = x[:, c:c + 1, :]                        # (Bt, 1, HW)
        enc = enc + xc * w_enc[:, c:c + 1][None]     # (Bt, hidden, HW)
        a1 = a1 + xc * w_a1[:, c:c + 1][None]        # (Bt, attn, HW)
    enc = jnp.maximum(enc, 0.0)                      # ReLU (VPU)
    a1 = jnp.maximum(a1, 0.0)                        # ReLU (VPU)

    # attention logits: contract the tiny attn axis (sublane reduce -> XLU).
    # (the final conv bias b_a2 is a constant shift -> cancels in softmax)
    logits = jnp.sum(a1 * w_a2_ref[...][None], axis=1, keepdims=True)   # (Bt, 1, HW)

    # per-image softmax over the flattened spatial axis (lane reductions -> XLU,
    # exp -> EUP; both largely hidden under the VALU work above).
    m = jnp.max(logits, axis=2, keepdims=True)       # (Bt, 1, 1)
    p = jnp.exp(logits - m)                          # (Bt, 1, HW)
    denom = jnp.sum(p, axis=2, keepdims=True)        # (Bt, 1, 1)

    # softmax-weighted spatial mean of the encoder features.
    pooled = jnp.sum(enc * p, axis=2)                # (Bt, hidden)
    inv = 1.0 / (denom[:, 0, :] * jnp.float32(hw))   # (Bt, 1): one normalise per image
    o_ref[...] = pooled * inv                        # dense (Bt, hidden) store


def _batch_tiling(B, C, HW, hidden, attn,
                  vmem_budget_bytes=6 * 1024 * 1024, max_tile=128):
    """Pick (padded batch, batch tile).

    Bt is either the full batch (small B, always layout-legal as a full-dim
    block) or the largest multiple of 8 (capped) whose per-step working set —
    double-buffered input tile + the (Bt, hidden, HW) encoder intermediates —
    fits a conservative VMEM budget (safe under v5e's 16 MiB scoped default).
    """
    bytes_per_img = 4 * (
        2 * C * HW           # double-buffered input tile
        + 3 * hidden * HW    # enc intermediates (+ margin for unfused temporaries)
        + attn * HW          # attention hidden map
        + 4 * HW             # logits / exp / misc row temporaries
        + 4 * hidden)        # pooled / output
    Bt = vmem_budget_bytes // max(bytes_per_img, 1)
    Bt = max(8, min(max_tile, (Bt // 8) * 8))
    if B <= Bt:
        return B, B                      # single grid step, full-dim block
    B_pad = ((B + Bt - 1) // Bt) * Bt
    return B_pad, Bt


def init_params(key, img_embedding_dim, hidden_dim):
    attn_dim = hidden_dim // 4
    k1, k2, k3, k4, k5, k6 = jax.random.split(key, 6)
    # 1x1 conv weights in PyTorch (out, in) layout; biases as column vectors.
    return {
        "w_enc": jax.random.normal(k1, (hidden_dim, img_embedding_dim), jnp.float32) * 0.1,
        "b_enc": jax.random.normal(k2, (hidden_dim, 1), jnp.float32) * 0.1,
        "w_a1": jax.random.normal(k3, (attn_dim, img_embedding_dim), jnp.float32) * 0.1,
        "b_a1": jax.random.normal(k4, (attn_dim, 1), jnp.float32) * 0.1,
        "w_a2": jax.random.normal(k5, (attn_dim, 1), jnp.float32) * 0.1,
        "b_a2": jax.random.normal(k6, (), jnp.float32) * 0.1,   # used only by reference
    }


def egocentric_view_encoder_pooled(x, params, *, u_img_emb=None, w_img_emb=None):
    """Forward pass.

    x: (*bs, C, H, W) float32 (NCHW, matching the PyTorch module), or pass
    u_img_emb / w_img_emb (each (*bs, C0, H, W)); they are concatenated
    channel-wise exactly as the PyTorch forward does before its convs.
    """
    if u_img_emb is not None and w_img_emb is not None:
        x = jnp.concatenate((u_img_emb, w_img_emb, u_img_emb * w_img_emb), axis=-3)
    assert x is not None

    hidden = params["w_enc"].shape[0]
    attn = params["w_a1"].shape[0]
    bs = x.shape[:-3]
    C, H, W = x.shape[-3:]
    assert C == params["w_enc"].shape[1]
    HW = H * W

    # Free reshape of NCHW -> (B, C, HW); no transpose, no extra HBM traffic.
    x_flat = x.reshape((-1, C, HW)).astype(jnp.float32)
    B = x_flat.shape[0]

    B_pad, Bt = _batch_tiling(B, C, HW, hidden, attn)
    if B_pad != B:
        x_flat = jnp.pad(x_flat, ((0, B_pad - B), (0, 0), (0, 0)))

    full2 = lambda b: (0, 0)
    out = pl.pallas_call(
        _ego_pool_kernel,
        out_shape=jax.ShapeDtypeStruct((B_pad, hidden), jnp.float32),
        grid_spec=pltpu.PrefetchScalarGridSpec(
            num_scalar_prefetch=0,
            grid=(B_pad // Bt,),
            in_specs=[
                pl.BlockSpec((Bt, C, HW), lambda b: (b, 0, 0)),
                pl.BlockSpec(params["w_enc"].shape, full2),
                pl.BlockSpec(params["b_enc"].shape, full2),
                pl.BlockSpec(params["w_a1"].shape, full2),
                pl.BlockSpec(params["b_a1"].shape, full2),
                pl.BlockSpec(params["w_a2"].shape, full2),
            ],
            out_specs=pl.BlockSpec((Bt, hidden), lambda b: (b, 0)),
        ),
        compiler_params=pltpu.CompilerParams(
            dimension_semantics=("parallel",)),
    )(x_flat, params["w_enc"], params["b_enc"], params["w_a1"],
      params["b_a1"], params["w_a2"])

    return out[:B].reshape(*bs, hidden)


def reference(x, params):
    """Pure-JAX re-implementation of the PyTorch forward (for verification).
    Includes the b_a2 bias exactly as the PyTorch module does."""
    bs = x.shape[:-3]
    C, H, W = x.shape[-3:]
    xf = x.reshape((-1, C, H * W))                                      # (B, C, HW)
    enc = jnp.maximum(jnp.einsum("hc,bcp->bhp", params["w_enc"], xf)
                      + params["b_enc"][None], 0.0)                     # (B, hidden, HW)
    a1 = jnp.maximum(jnp.einsum("ac,bcp->bap", params["w_a1"], xf)
                     + params["b_a1"][None], 0.0)                       # (B, attn, HW)
    logits = jnp.einsum("a,bap->bp", params["w_a2"][:, 0], a1) + params["b_a2"]
    probs = jax.nn.softmax(logits, axis=-1)                             # (B, HW)
    pooled = jnp.sum(enc * probs[:, None, :], axis=-1) / (H * W)        # (B, hidden)
    return pooled.reshape(*bs, -1)


if __name__ == "__main__":
    img_embedding_dim = 4
    hidden_dim = 32
    H = W = 16

    key = jax.random.PRNGKey(0)
    kx, kp, kx2, kx3, ku, kw, kp2 = jax.random.split(key, 7)
    params = init_params(kp, img_embedding_dim, hidden_dim)

    # Small canonical case: batch=2 (single grid step, full-batch block).
    x = jax.random.normal(kx, (2, img_embedding_dim, H, W), jnp.float32)
    out = jax.block_until_ready(egocentric_view_encoder_pooled(x, params))
    ref = reference(x, params)
    assert out.shape == (2, hidden_dim)
    assert jnp.allclose(out, ref, atol=1e-4, rtol=1e-4)

    # Multi-dim batch, still a single grid step (B=40 fits one batch tile).
    x2 = jax.random.normal(kx2, (5, 8, img_embedding_dim, H, W), jnp.float32)
    out2 = jax.block_until_ready(egocentric_view_encoder_pooled(x2, params))
    ref2 = reference(x2, params)
    assert out2.shape == (5, 8, hidden_dim)
    assert jnp.allclose(out2, ref2, atol=1e-4, rtol=1e-4)

    # Larger case exercising batch tiling (multiple grid steps) and padding.
    x3 = jax.random.normal(kx3, (2, 75, img_embedding_dim, H, W), jnp.float32)
    out3 = jax.block_until_ready(egocentric_view_encoder_pooled(x3, params))
    ref3 = reference(x3, params)
    assert out3.shape == (2, 75, hidden_dim)
    assert jnp.allclose(out3, ref3, atol=1e-4, rtol=1e-4)

    # Optional (u_img_emb, w_img_emb) path: channel concat then the same kernel.
    base_dim, hidden2 = 2, 16
    params2 = init_params(kp2, 3 * base_dim, hidden2)
    u = jax.random.normal(ku, (3, base_dim, 8, 8), jnp.float32)
    w = jax.random.normal(kw, (3, base_dim, 8, 8), jnp.float32)
    out4 = jax.block_until_ready(
        egocentric_view_encoder_pooled(None, params2, u_img_emb=u, w_img_emb=w))
    ref4 = reference(jnp.concatenate((u, w, u * w), axis=-3), params2)
    assert out4.shape == (3, hidden2)
    assert jnp.allclose(out4, ref4, atol=1e-4, rtol=1e-4)

    print("KERNEL_OK")
</pallas_src>

<mosaic_0001>
module attributes {stable_mosaic.version = 11 : i64} {
  func.func @_ego_pool_kernel(%arg0: i32, %arg1: memref<2x4x256xf32, #tpu.memory_space<vmem>>, %arg2: memref<32x4xf32, #tpu.memory_space<vmem>>, %arg3: memref<32x1xf32, #tpu.memory_space<vmem>>, %arg4: memref<8x4xf32, #tpu.memory_space<vmem>>, %arg5: memref<8x1xf32, #tpu.memory_space<vmem>>, %arg6: memref<8x1xf32, #tpu.memory_space<vmem>>, %arg7: memref<2x32xf32, #tpu.memory_space<vmem>>) attributes {dimension_semantics = [#tpu.dimension_semantics<parallel>], iteration_bounds = array<i64: 1>, scalar_prefetch = 0 : i64, scratch_operands = 0 : i64, tpu.core_type = #tpu.core_type<tc>, window_params = [{transform_indices = @transform_0, window_bounds = array<i64: 2, 4, 256>}, {pipeline_mode = #tpu.pipeline_mode<synchronous>, transform_indices = @transform_1, window_bounds = array<i64: 32, 4>}, {pipeline_mode = #tpu.pipeline_mode<synchronous>, transform_indices = @transform_2, window_bounds = array<i64: 32, 1>}, {pipeline_mode = #tpu.pipeline_mode<synchronous>, transform_indices = @transform_3, window_bounds = array<i64: 8, 4>}, {pipeline_mode = #tpu.pipeline_mode<synchronous>, transform_indices = @transform_4, window_bounds = array<i64: 8, 1>}, {pipeline_mode = #tpu.pipeline_mode<synchronous>, transform_indices = @transform_5, window_bounds = array<i64: 8, 1>}, {transform_indices = @transform_6, window_bounds = array<i64: 2, 32>}]} {
    %c0 = arith.constant 0 : index
    %c0_0 = arith.constant 0 : index
    %c0_1 = arith.constant 0 : index
    %0 = vector.load %arg1[%c0, %c0_0, %c0_1] : memref<2x4x256xf32, #tpu.memory_space<vmem>>, vector<2x4x256xf32>
    %c0_2 = arith.constant 0 : index
    %c0_3 = arith.constant 0 : index
    %1 = vector.load %arg2[%c0_2, %c0_3] : memref<32x4xf32, #tpu.memory_space<vmem>>, vector<32x4xf32>
    %c0_4 = arith.constant 0 : index
    %c0_5 = arith.constant 0 : index
    %2 = vector.load %arg4[%c0_4, %c0_5] : memref<8x4xf32, #tpu.memory_space<vmem>>, vector<8x4xf32>
    %c0_6 = arith.constant 0 : index
    %c0_7 = arith.constant 0 : index
    %3 = vector.load %arg3[%c0_6, %c0_7] : memref<32x1xf32, #tpu.memory_space<vmem>>, vector<32x1xf32>
    %4 = vector.shape_cast %3 : vector<32x1xf32> to vector<1x32x1xf32>
    %c0_8 = arith.constant 0 : index
    %c0_9 = arith.constant 0 : index
    %5 = vector.load %arg5[%c0_8, %c0_9] : memref<8x1xf32, #tpu.memory_space<vmem>>, vector<8x1xf32>
    %6 = vector.shape_cast %5 : vector<8x1xf32> to vector<1x8x1xf32>
    %7 = vector.extract_strided_slice %0 {offsets = [0, 0, 0], sizes = [2, 1, 256], strides = [1, 1, 1]} : vector<2x4x256xf32> to vector<2x1x256xf32>
    %8 = vector.extract_strided_slice %1 {offsets = [0, 0], sizes = [32, 1], strides = [1, 1]} : vector<32x4xf32> to vector<32x1xf32>
    %9 = vector.shape_cast %8 : vector<32x1xf32> to vector<1x32x1xf32>
    %10 = vector.broadcast %7 : vector<2x1x256xf32> to vector<2x32x256xf32>
    %11 = vector.broadcast %9 : vector<1x32x1xf32> to vector<2x32x256xf32>
    %12 = arith.mulf %10, %11 : vector<2x32x256xf32>
    %13 = vector.broadcast %4 : vector<1x32x1xf32> to vector<2x32x256xf32>
    %14 = arith.addf %13, %12 : vector<2x32x256xf32>
    %15 = vector.extract_strided_slice %2 {offsets = [0, 0], sizes = [8, 1], strides = [1, 1]} : vector<8x4xf32> to vector<8x1xf32>
    %16 = vector.shape_cast %15 : vector<8x1xf32> to vector<1x8x1xf32>
    %17 = vector.broadcast %7 : vector<2x1x256xf32> to vector<2x8x256xf32>
    %18 = vector.broadcast %16 : vector<1x8x1xf32> to vector<2x8x256xf32>
    %19 = arith.mulf %17, %18 : vector<2x8x256xf32>
    %20 = vector.broadcast %6 : vector<1x8x1xf32> to vector<2x8x256xf32>
    %21 = arith.addf %20, %19 : vector<2x8x256xf32>
    %22 = vector.extract_strided_slice %0 {offsets = [0, 1, 0], sizes = [2, 1, 256], strides = [1, 1, 1]} : vector<2x4x256xf32> to vector<2x1x256xf32>
    %23 = vector.extract_strided_slice %1 {offsets = [0, 1], sizes = [32, 1], strides = [1, 1]} : vector<32x4xf32> to vector<32x1xf32>
    %24 = vector.shape_cast %23 : vector<32x1xf32> to vector<1x32x1xf32>
    %25 = vector.broadcast %22 : vector<2x1x256xf32> to vector<2x32x256xf32>
    %26 = vector.broadcast %24 : vector<1x32x1xf32> to vector<2x32x256xf32>
    %27 = arith.mulf %25, %26 : vector<2x32x256xf32>
    %28 = arith.addf %14, %27 : vector<2x32x256xf32>
    %29 = vector.extract_strided_slice %2 {offsets = [0, 1], sizes = [8, 1], strides = [1, 1]} : vector<8x4xf32> to vector<8x1xf32>
    %30 = vector.shape_cast %29 : vector<8x1xf32> to vector<1x8x1xf32>
    %31 = vector.broadcast %22 : vector<2x1x256xf32> to vector<2x8x256xf32>
    %32 = vector.broadcast %30 : vector<1x8x1xf32> to vector<2x8x256xf32>
    %33 = arith.mulf %31, %32 : vector<2x8x256xf32>
    %34 = arith.addf %21, %33 : vector<2x8x256xf32>
    %35 = vector.extract_strided_slice %0 {offsets = [0, 2, 0], sizes = [2, 1, 256], strides = [1, 1, 1]} : vector<2x4x256xf32> to vector<2x1x256xf32>
    %36 = vector.extract_strided_slice %1 {offsets = [0, 2], sizes = [32, 1], strides = [1, 1]} : vector<32x4xf32> to vector<32x1xf32>
    %37 = vector.shape_cast %36 : vector<32x1xf32> to vector<1x32x1xf32>
    %38 = vector.broadcast %35 : vector<2x1x256xf32> to vector<2x32x256xf32>
    %39 = vector.broadcast %37 : vector<1x32x1xf32> to vector<2x32x256xf32>
    %40 = arith.mulf %38, %39 : vector<2x32x256xf32>
    %41 = arith.addf %28, %40 : vector<2x32x256xf32>
    %42 = vector.extract_strided_slice %2 {offsets = [0, 2], sizes = [8, 1], strides = [1, 1]} : vector<8x4xf32> to vector<8x1xf32>
    %43 = vector.shape_cast %42 : vector<8x1xf32> to vector<1x8x1xf32>
    %44 = vector.broadcast %35 : vector<2x1x256xf32> to vector<2x8x256xf32>
    %45 = vector.broadcast %43 : vector<1x8x1xf32> to vector<2x8x256xf32>
    %46 = arith.mulf %44, %45 : vector<2x8x256xf32>
    %47 = arith.addf %34, %46 : vector<2x8x256xf32>
    %48 = vector.extract_strided_slice %0 {offsets = [0, 3, 0], sizes = [2, 1, 256], strides = [1, 1, 1]} : vector<2x4x256xf32> to vector<2x1x256xf32>
    %49 = vector.extract_strided_slice %1 {offsets = [0, 3], sizes = [32, 1], strides = [1, 1]} : vector<32x4xf32> to vector<32x1xf32>
    %50 = vector.shape_cast %49 : vector<32x1xf32> to vector<1x32x1xf32>
    %51 = vector.broadcast %48 : vector<2x1x256xf32> to vector<2x32x256xf32>
    %52 = vector.broadcast %50 : vector<1x32x1xf32> to vector<2x32x256xf32>
    %53 = arith.mulf %51, %52 : vector<2x32x256xf32>
    %54 = arith.addf %41, %53 : vector<2x32x256xf32>
    %55 = vector.extract_strided_slice %2 {offsets = [0, 3], sizes = [8, 1], strides = [1, 1]} : vector<8x4xf32> to vector<8x1xf32>
    %56 = vector.shape_cast %55 : vector<8x1xf32> to vector<1x8x1xf32>
    %57 = vector.broadcast %48 : vector<2x1x256xf32> to vector<2x8x256xf32>
    %58 = vector.broadcast %56 : vector<1x8x1xf32> to vector<2x8x256xf32>
    %59 = arith.mulf %57, %58 : vector<2x8x256xf32>
    %60 = arith.addf %47, %59 : vector<2x8x256xf32>
    %cst = arith.constant 0.000000e+00 : f32
    %61 = vector.broadcast %cst : f32 to vector<2x32x256xf32>
    %62 = arith.maximumf %54, %61 : vector<2x32x256xf32>
    %cst_10 = arith.constant 0.000000e+00 : f32
    %63 = vector.broadcast %cst_10 : f32 to vector<2x8x256xf32>
    %64 = arith.maximumf %60, %63 : vector<2x8x256xf32>
    %c0_11 = arith.constant 0 : index
    %c0_12 = arith.constant 0 : index
    %65 = vector.load %arg6[%c0_11, %c0_12] : memref<8x1xf32, #tpu.memory_space<vmem>>, vector<8x1xf32>
    %66 = vector.shape_cast %65 : vector<8x1xf32> to vector<1x8x1xf32>
    %67 = vector.broadcast %66 : vector<1x8x1xf32> to vector<2x8x256xf32>
    %68 = arith.mulf %64, %67 : vector<2x8x256xf32>
    %cst_13 = arith.constant dense<0.000000e+00> : vector<2x256xf32>
    %69 = vector.multi_reduction <add>, %68, %cst_13 [1] : vector<2x8x256xf32> to vector<2x256xf32>
    %70 = vector.shape_cast %69 : vector<2x256xf32> to vector<2x1x256xf32>
    %cst_14 = arith.constant dense<0xFF800000> : vector<2x1xf32>
    %71 = vector.multi_reduction <maximumf>, %70, %cst_14 [2] : vector<2x1x256xf32> to vector<2x1xf32>
    %72 = vector.shape_cast %71 : vector<2x1xf32> to vector<2x1x1xf32>
    %73 = vector.broadcast %72 : vector<2x1x1xf32> to vector<2x1x256xf32>
    %74 = arith.subf %70, %73 : vector<2x1x256xf32>
    %75 = math.exp %74 : vector<2x1x256xf32>
    %cst_15 = arith.constant dense<0.000000e+00> : vector<2x1xf32>
    %76 = vector.multi_reduction <add>, %75, %cst_15 [2] : vector<2x1x256xf32> to vector<2x1xf32>
    %77 = vector.shape_cast %76 : vector<2x1xf32> to vector<2x1x1xf32>
    %78 = vector.broadcast %75 : vector<2x1x256xf32> to vector<2x32x256xf32>
    %79 = arith.mulf %62, %78 : vector<2x32x256xf32>
    %cst_16 = arith.constant dense<0.000000e+00> : vector<2x32xf32>
    %80 = vector.multi_reduction <add>, %79, %cst_16 [2] : vector<2x32x256xf32> to vector<2x32xf32>
    %81 = vector.shape_cast %77 : vector<2x1x1xf32> to vector<2x1xf32>
    %cst_17 = arith.constant 2.560000e+02 : f32
    %82 = vector.broadcast %cst_17 : f32 to vector<2x1xf32>
    %83 = arith.mulf %81, %82 : vector<2x1xf32>
    %cst_18 = arith.constant 1.000000e+00 : f32
    %84 = vector.broadcast %cst_18 : f32 to vector<2x1xf32>
    %85 = arith.divf %84, %83 : vector<2x1xf32>
    %86 = vector.broadcast %85 : vector<2x1xf32> to vector<2x32xf32>
    %87 = arith.mulf %80, %86 : vector<2x32xf32>
    %c0_19 = arith.constant 0 : index
    %c0_20 = arith.constant 0 : index
    %88 = vector.load %arg7[%c0_19, %c0_20] : memref<2x32xf32, #tpu.memory_space<vmem>>, vector<2x32xf32>
    tpu.vector_store %arg7[%c0_19, %c0_20], %87 {strides = array<i32>} : memref<2x32xf32, #tpu.memory_space<vmem>>, vector<2x32xf32>,
    return
  }
  func.func @transform_0(%arg0: i32) -> (i32, i32, i32) {
    %c0_i32 = arith.constant 0 : i32
    %c0_i32_0 = arith.constant 0 : i32
    %c0_i32_1 = arith.constant 0 : i32
    return %arg0, %c0_i32, %c0_i32_0 : i32, i32, i32
  }
  func.func @transform_1(%arg0: i32) -> (i32, i32) {
    %c0_i32 = arith.constant 0 : i32
    %c0_i32_0 = arith.constant 0 : i32
    %c0_i32_1 = arith.constant 0 : i32
    return %c0_i32, %c0_i32_0 : i32, i32
  }
  func.func @transform_2(%arg0: i32) -> (i32, i32) {
    %c0_i32 = arith.constant 0 : i32
    %c0_i32_0 = arith.constant 0 : i32
    %c0_i32_1 = arith.constant 0 : i32
    return %c0_i32, %c0_i32_0 : i32, i32
  }
  func.func @transform_3(%arg0: i32) -> (i32, i32) {
    %c0_i32 = arith.constant 0 : i32
    %c0_i32_0 = arith.constant 0 : i32
    %c0_i32_1 = arith.constant 0 : i32
    return %c0_i32, %c0_i32_0 : i32, i32
  }
  func.func @transform_4(%arg0: i32) -> (i32, i32) {
    %c0_i32 = arith.constant 0 : i32
    %c0_i32_0 = arith.constant 0 : i32
    %c0_i32_1 = arith.constant 0 : i32
    return %c0_i32, %c0_i32_0 : i32, i32
  }
  func.func @transform_5(%arg0: i32) -> (i32, i32) {
    %c0_i32 = arith.constant 0 : i32
    %c0_i32_0 = arith.constant 0 : i32
    %c0_i32_1 = arith.constant 0 : i32
    return %c0_i32, %c0_i32_0 : i32, i32
  }
  func.func @transform_6(%arg0: i32) -> (i32, i32) {
    %c0_i32 = arith.constant 0 : i32
    %c0_i32_0 = arith.constant 0 : i32
    return %arg0, %c0_i32 : i32, i32
  }
}

</mosaic_0001>

<bundles_post_ra>
// kernel: tpu_custom_call.1
= control target key start
LH: loop header
LB: loop body
LE: loop exit
PB: predicated region body
PF: predicated region fallthrough
CT: control target
= control target key end

     0   :  { %v624_v2 = vmov 2   ;;  %v625_v3 = vmov 0   ;;  %s965_s0 = inlined_call_operand.vmem [shape: f32[2,4,256], index: 0, kind: input, shape index: {}]   ;;  %s966_s1 = inlined_call_operand.vmem [shape: f32[32,4], index: 1, kind: input, shape index: {}]   ;;  %s967_s2 = inlined_call_operand.vmem [shape: f32[32,1], index: 2, kind: input, shape index: {}]   ;;  %s968_s3 = inlined_call_operand.vmem [shape: f32[8,4], index: 3, kind: input, shape index: {}]   ;;  %s969_s4 = inlined_call_operand.vmem [shape: f32[8,1], index: 4, kind: input, shape index: {}]   ;;  %s970_s5 = inlined_call_operand.vmem [shape: f32[8,1], index: 5, kind: input, shape index: {}]   ;;  %s971_s6 = inlined_call_operand.hbm [shape: f32[2,32], index: 6, kind: output, shape index: {}]  }
   0x1   :  { %v30_v0 = vld [vmem:[%s968_s3] sm:$0xff]  ;;  %v28_v1 = vld [vmem:[%s966_s1 + $0x10] sm:$0xff]  ;;  %573 = vset.pattern.permute.xlu0 %v624_v2  ;;  %570 = vset.pattern.permute.xlu1 %v625_v3 }
   0x2   :  { %v35_v4 = vld [vmem:[%s969_s4] sm:$0xff]  ;;  %273 = vperm.xlu0 %573, %v30_v0   ;;  %62 = vperm.xlu1 %570, %v28_v1  }
   0x3   :  { %11 = vsyncpa [#allocation3], 0  ;;  %571 = vset.pattern.permute.xlu2 %v625_v3  ;;  %v26_v5 = vld [vmem:[%s966_s1] sm:$0xff]  ;;  %v626_v6 = vmov 1   ;;  %v679_v7 = vld [vmem:[%s966_s1 + $0x8] sm:$0xff]  ;;  %v627_v8 = vmov 3  }
   0x4   :  { %133 = vperm.xlu2 %571, %v35_v4   ;;  %v376_v9 = vld [vmem:[%s970_s5] sm:$0xff]  ;;  %v32_v10 = vld [vmem:[%s967_s2 + $0x8] sm:$0xff]  ;;  %v691_v11 = vld [vmem:[%s966_s1 + $0x18] sm:$0xff]  ;;  %vm527_vm8 = vcmask 130112   ;;  %vm531_vm9 = vcmask 195712   ;;  %vm535_vm10 = vcmask 261312  }
   0x5   :  { %v31_v12 = vld [vmem:[%s967_s2] sm:$0xff]  ;;  %v33_v13 = vld [vmem:[%s967_s2 + $0x10] sm:$0xff]  ;;  %v34_v14 = vld [vmem:[%s967_s2 + $0x18] sm:$0xff]  ;;  %s556_s21 = sshll.u32 %s971_s6, 4  ;;  %vm544_vm11 = vcmask 1041409   ;;  %vm547_vm12 = vcmask 254976   ;;  %s557_s21 = int_to_ptr.hbm [resolvable:$true] %s556_s21 }
   0x6   :  { %v24_v15 = vld [vmem:[%s965_s0] sm:$0xff]  ;;  %v25_v16 = vld [vmem:[%s965_s0 + $0x8] sm:$0xff]  ;;  %s628_s0 = smov [#allocation2]  }
   0x7   :  { %v38_v17 = vperm.slane %v24_v15, 0  ;;  %v39_v18 = vperm.slane %v24_v15, 4  ;;  %v40_v19 = vperm.slane %v25_v16, 0  ;;  %v41_v20 = vperm.slane %v25_v16, 4  ;;  %s554_s18 = sshll.u32 %s628_s0, 4  ;;  %s555_s18 = int_to_ptr.vmem [resolvable:$true] %s554_s18 }
   0x8   :  { %v140_v26 = vperm.slane %v24_v15, 1  ;;  %v141_v27 = vperm.slane %v24_v15, 5  ;;  %v142_v28 = vperm.slane %v25_v16, 1  ;;  %v143_v29 = vperm.slane %v25_v16, 5 }
   0x9   :  { %v713_v22 = vperm.slane %v38_v17, 0  ;;  %v715_v23 = vperm.slane %v39_v18, 0  ;;  %v717_v24 = vperm.slane %v40_v19, 0  ;;  %v719_v25 = vperm.slane %v41_v20, 0 }
   0xa   :  { %574 = vset.pattern.permute.xlu0 %v625_v3  ;;  %124 = vperm.xlu1 %570, %v30_v0   ;;  %v212_v36 = vperm.slane %v24_v15, 2  ;;  %v213_v37 = vperm.slane %v24_v15, 6  ;;  %v214_v38 = vperm.slane %v25_v16, 2  ;;  %v215_v39 = vperm.slane %v25_v16, 6 }
   0xb   :  { %52 = vperm.xlu0 %574, %v26_v5   ;;  %v733_v40 = vperm.slane %v140_v26, 1  ;;  %v735_v41 = vperm.slane %v141_v27, 1  ;;  %v737_v42 = vperm.slane %v142_v28, 1  ;;  %v739_v43 = vperm.slane %v143_v29, 1 }
   0xc   :  { %572 = vset.pattern.permute.xlu2 %v626_v6  ;;  %v741_v45 = vperm.slane %v212_v36, 2  ;;  %v743_v46 = vperm.slane %v213_v37, 2  ;;  %v745_v47 = vperm.slane %v214_v38, 2  ;;  %v747_v48 = vperm.slane %v215_v39, 2 }
   0xd   :  { %201 = vperm.xlu2 %572, %v30_v0   ;;  %v284_v59 = vperm.slane %v24_v15, 3  ;;  %v285_v60 = vperm.slane %v24_v15, 7  ;;  %v286_v61 = vperm.slane %v25_v16, 3  ;;  %v287_v62 = vperm.slane %v25_v16, 7 }
   0xf   :  { %v767_v15 = vperm.slane %v286_v61, 3  ;;  %v769_v16 = vperm.slane %v287_v62, 3 }
  0x12   :  { %575 = vset.pattern.permute.xlu1 %v627_v8 }
  0x13   :  { %345 = vperm.xlu1 %575, %v30_v0   ;;  %57 = vperm.xlu0 %574, %v679_v7  }
  0x15   :  { %576 = vset.pattern.permute.xlu2 %v625_v3 }
  0x16   :  { %379 = vperm.xlu2 %576, %v376_v9  }
  0x1b   :  { %577 = vset.pattern.permute.xlu1 %v625_v3  ;;  %93 = vperm.xlu0 %574, %v32_v10  }
  0x1c   :  { %67 = vperm.xlu1 %577, %v691_v11  }
  0x1e   :  { %88 = vperm.xlu2 %576, %v31_v12  }
  0x23   :  { %578 = vset.pattern.permute.xlu0 %v626_v6 }
  0x24   :  { %98 = vperm.xlu1 %577, %v33_v13   ;;  %153 = vperm.xlu0 %578, %v26_v5   ;;  %v763_v13 = vperm.slane %v284_v59, 3 }
  0x26   :  { %103 = vperm.xlu2 %576, %v34_v14   ;;  %v765_v14 = vperm.slane %v285_v60, 3 }
  0x2c   :  { %157 = vperm.xlu0 %578, %v679_v7   ;;  %580 = vset.pattern.permute.xlu1 %v624_v2 }
  0x2d   :  { %229 = vperm.xlu1 %580, %v679_v7  }
  0x2e   :  { %579 = vset.pattern.permute.xlu2 %v624_v2 }
  0x2f   :  { %225 = vperm.xlu2 %579, %v26_v5  }
  0x34   :  { %161 = vperm.xlu0 %578, %v28_v1  }
  0x35   :  { %583 = vset.pattern.permute.xlu1 %v627_v8 }
  0x37   :  { %582 = vset.pattern.permute.xlu2 %v627_v8 }
  0x38   :  { %297 = vperm.xlu2 %582, %v26_v5  }
  0x3c   :  { %165 = vperm.xlu0 %578, %v691_v11  }
  0x44   :  { %581 = vset.pattern.permute.xlu0 %v624_v2 }
  0x45   :  { %233 = vperm.xlu0 %581, %v28_v1  }
  0x4d   :  { %237 = vperm.xlu0 %581, %v691_v11  }
  0x55   :  { %584 = vset.pattern.permute.xlu0 %v627_v8 }
  0x56   :  { %305 = vperm.xlu0 %584, %v28_v1  }
  0x5e   :  { %585 = vset.pattern.permute.xlu0 %v625_v3  ;;  %v134_v21 = vpop.permute.xlu2 %133 }
  0x67   :  { %v202_v44 = vpop.permute.xlu2 %201 }
  0x68   :  { %v204_v49 = vmul.f32 %v202_v44, %v733_v40  ;;  %v205_v50 = vmul.f32 %v202_v44, %v735_v41  ;;  %v206_v51 = vmul.f32 %v202_v44, %v737_v42  ;;  %v207_v52 = vmul.f32 %v202_v44, %v739_v43 }
  0x74   :  { %v63_v30 = vpop.permute.xlu1 %62  ;;  %v274_v31 = vpop.permute.xlu0 %273 }
  0x75   :  { %v722_v32 = vmul.f32 %v63_v30, %v713_v22  ;;  %v725_v33 = vmul.f32 %v63_v30, %v715_v23  ;;  %v728_v34 = vmul.f32 %v63_v30, %v717_v24  ;;  %v731_v35 = vmul.f32 %v63_v30, %v719_v25 }
  0x76   :  { %v276_v3 = vmul.f32 %v274_v31, %v741_v45  ;;  %v277_v4 = vmul.f32 %v274_v31, %v743_v46  ;;  %v278_v5 = vmul.f32 %v274_v31, %v745_v47  ;;  %v279_v6 = vmul.f32 %v274_v31, %v747_v48 }
  0x7c   :  { %v125_v53 = vpop.permute.xlu1 %124 }
  0x7d   :  { %v127_v54 = vmul.f32 %v125_v53, %v713_v22  ;;  %v128_v55 = vmul.f32 %v125_v53, %v715_v23  ;;  %v129_v56 = vmul.f32 %v125_v53, %v717_v24  ;;  %v130_v57 = vmul.f32 %v125_v53, %v719_v25  ;;  %v757_v58 = vpop.permute.xlu0 %52 }
  0x7f   :  { %v136_v63 = vadd.f32 %v134_v21, %v127_v54  ;;  %v137_v0 = vadd.f32 %v134_v21, %v128_v55  ;;  %v138_v1 = vadd.f32 %v134_v21, %v129_v56  ;;  %v139_v2 = vadd.f32 %v134_v21, %v130_v57  ;;  %v380_v55 = vpop.permute.xlu2 %379 }
  0x81   :  { %v208_v8 = vadd.f32 %v204_v49, %v136_v63  ;;  %v209_v9 = vadd.f32 %v205_v50, %v137_v0  ;;  %v210_v10 = vadd.f32 %v206_v51, %v138_v1  ;;  %v211_v12 = vadd.f32 %v207_v52, %v139_v2 }
  0x83   :  { %v280_v18 = vadd.f32 %v276_v3, %v208_v8  ;;  %v281_v19 = vadd.f32 %v277_v4, %v209_v9  ;;  %v282_v20 = vadd.f32 %v278_v5, %v210_v10  ;;  %v283_v21 = vadd.f32 %v279_v6, %v211_v12 }
  0x85   :  { %v346_v17 = vpop.permute.xlu1 %345  ;;  %v58_v26 = vpop.permute.xlu0 %57 }
  0x86   :  { %v348_v27 = vmul.f32 %v346_v17, %v763_v13  ;;  %v349_v28 = vmul.f32 %v346_v17, %v765_v14  ;;  %v350_v29 = vmul.f32 %v346_v17, %v767_v15  ;;  %v351_v30 = vmul.f32 %v346_v17, %v769_v16 }
  0x87   :  { %v776_v31 = vmul.f32 %v58_v26, %v713_v22  ;;  %v779_v36 = vmul.f32 %v58_v26, %v715_v23  ;;  %v80_v37 = vmul.f32 %v58_v26, %v717_v24  ;;  %v81_v38 = vmul.f32 %v58_v26, %v719_v25 }
  0x88   :  { %v352_v39 = vadd.f32 %v348_v27, %v280_v18  ;;  %v353_v44 = vadd.f32 %v349_v28, %v281_v19  ;;  %v354_v49 = vadd.f32 %v350_v29, %v282_v20  ;;  %v355_v50 = vadd.f32 %v351_v30, %v283_v21 }
  0x8a   :  { %v372_v51 = vmax.f32 %v352_v39, 0.0  ;;  %v373_v52 = vmax.f32 %v353_v44, 0.0  ;;  %v374_v53 = vmax.f32 %v354_v49, 0.0  ;;  %v375_v54 = vmax.f32 %v355_v50, 0.0 }
  0x8c   :  { %v384_v56 = vmul.f32 %v380_v55, %v374_v53  ;;  %v385_v57 = vmul.f32 %v380_v55, %v375_v54  ;;  %v382_v59 = vmul.f32 %v380_v55, %v372_v51  ;;  %v383_v60 = vmul.f32 %v380_v55, %v373_v52  ;;  %v89_v52 = vpop.permute.xlu2 %88 }
  0x8d   :  { %v783_v61 = vpop.permute.xlu0 %93 }
  0x8e   :  { %v786_v62 = vadd.f32 %v783_v61, %v80_v37  ;;  %v789_v63 = vadd.f32 %v783_v61, %v81_v38  ;;  %v398_v0 = vrot.slane %v384_v56, 4  ;;  %v404_v1 = vrot.slane %v385_v57, 4 }
  0x8f   :  { %v386_v2 = vrot.slane %v382_v59, 4  ;;  %v392_v3 = vrot.slane %v383_v60, 4 }
  0x90   :  { %v399_v4 = vadd.f32 %v398_v0, %v384_v56  ;;  %v405_v5 = vadd.f32 %v404_v1, %v385_v57  ;;  %v68_v56 = vpop.permute.xlu1 %67  ;;  %v79_v0 = vmul.f32 %v757_v58, %v719_v25 }
  0x91   :  { %v387_v6 = vadd.f32 %v386_v2, %v382_v59  ;;  %v393_v8 = vadd.f32 %v392_v3, %v383_v60  ;;  %v70_v59 = vmul.f32 %v757_v58, %v713_v22  ;;  %v71_v60 = vmul.f32 %v757_v58, %v715_v23 }
  0x92   :  { %v400_v9 = vrot.slane %v399_v4, 2  ;;  %v406_v10 = vrot.slane %v405_v5, 2 }
  0x93   :  { %v388_v12 = vrot.slane %v387_v6, 2  ;;  %v394_v17 = vrot.slane %v393_v8, 2 }
  0x94   :  { %v401_v18 = vadd.f32 %v400_v9, %v399_v4  ;;  %v407_v19 = vadd.f32 %v406_v10, %v405_v5  ;;  %v104_v54 = vpop.permute.xlu2 %103  ;;  %v106_v4 = vadd.f32 %v89_v52, %v70_v59  ;;  %v107_v5 = vadd.f32 %v89_v52, %v71_v60 }
  0x95   :  { %v389_v20 = vadd.f32 %v388_v12, %v387_v6  ;;  %v395_v21 = vadd.f32 %v394_v17, %v393_v8  ;;  %v115_v9 = vadd.f32 %v89_v52, %v79_v0 }
  0x96   :  { %v402_v26 = vrot.slane %v401_v18, 1  ;;  %v408_v27 = vrot.slane %v407_v19, 1  ;;  %v154_v50 = vpop.permute.xlu0 %153 }
  0x97   :  { %v390_v28 = vrot.slane %v389_v20, 1  ;;  %v396_v29 = vrot.slane %v395_v21, 1  ;;  %v168_v1 = vmul.f32 %v154_v50, %v733_v40  ;;  %v169_v2 = vmul.f32 %v154_v50, %v735_v41 }
  0x98   :  { %v791_v30 = vadd.f32 %v402_v26, %v401_v18  ;;  %v793_v37 = vadd.f32 %v408_v27, %v407_v19  ;;  %v176_v3 = vmul.f32 %v154_v50, %v737_v42  ;;  %v177_v8 = vmul.f32 %v154_v50, %v739_v43  ;;  %v99_v17 = vpop.permute.xlu1 %98 }
  0x99   :  { %v795_v38 = vadd.f32 %v390_v28, %v389_v20  ;;  %v797_v39 = vadd.f32 %v396_v29, %v395_v21  ;;  %v185_v19 = vadd.f32 %v169_v2, %v107_v5  ;;  %v76_v26 = vmul.f32 %v68_v56, %v713_v22 }
  0x9a   :  { %v413_v44 = vmax.f32 %v791_v30, %v793_v37  ;;  %v77_v27 = vmul.f32 %v68_v56, %v715_v23  ;;  %v193_v29 = vadd.f32 %v177_v8, %v115_v9  ;;  %v838_v23 = vadd.f32 %v783_v61, %v776_v31 }
  0x9b   :  { %v410_v49 = vmax.f32 %v795_v38, %v797_v39  ;;  %v111_v5 = vadd.f32 %v99_v17, %v725_v33  ;;  %v118_v31 = vadd.f32 %v99_v17, %v728_v34  ;;  %v119_v9 = vadd.f32 %v99_v17, %v731_v35 }
  0x9c   :  { %414 = vmax.xlane.f32.xlu2 %v413_v44  ;;  %v226_v57 = vpop.permute.xlu2 %225  ;;  %v84_v44 = vmul.f32 %v68_v56, %v717_v24 }
  0x9d   :  { %411 = vmax.xlane.f32.xlu1 %v410_v49  ;;  %v240_v10 = vmul.f32 %v226_v57, %v741_v45  ;;  %v241_v12 = vmul.f32 %v226_v57, %v743_v46  ;;  %v248_v18 = vmul.f32 %v226_v57, %v745_v47  ;;  %v249_v28 = vmul.f32 %v226_v57, %v747_v48 }
  0x9e   :  { %v805_v51 = vpop.permute.xlu0 %157  ;;  %v85_v49 = vmul.f32 %v68_v56, %v719_v25  ;;  %v112_v25 = vadd.f32 %v104_v54, %v76_v26  ;;  %v844_v56 = vadd.f32 %v104_v54, %v77_v27  ;;  %v120_v2 = vadd.f32 %v104_v54, %v84_v44 }
  0x9f   :  { %v257_v0 = vadd.f32 %v241_v12, %v185_v19  ;;  %v864_v33 = vmul.f32 %v805_v51, %v733_v40  ;;  %v873_v35 = vmul.f32 %v805_v51, %v735_v41 }
  0xa4   :  { %v298_v21 = vpop.permute.xlu2 %297 }
  0xa5   :  { %v312_v50 = vmul.f32 %v298_v21, %v763_v13  ;;  %v320_v59 = vmul.f32 %v298_v21, %v767_v15  ;;  %v321_v57 = vmul.f32 %v298_v21, %v769_v16 }
  0xa6   :  { %v162_v53 = vpop.permute.xlu0 %161 }
  0xa7   :  { %v181_v34 = vmul.f32 %v162_v53, %v739_v43 }
  0xae   :  { %v807_v55 = vpop.permute.xlu0 %165 }
  0xaf   :  { %v174_v12 = vmul.f32 %v807_v55, %v733_v40  ;;  %v175_v44 = vmul.f32 %v807_v55, %v735_v41 }
  0xb4   :  { %309 = vperm.xlu2 %582, %v691_v11   ;;  %v78_v11 = vmul.f32 %v757_v58, %v717_v24  ;;  %v184_v58 = vadd.f32 %v168_v1, %v106_v4  ;;  %v842_v24 = vadd.f32 %v783_v61, %v779_v36  ;;  %v265_v1 = vadd.f32 %v249_v28, %v193_v29 }
  0xb5   :  { %v110_v4 = vadd.f32 %v99_v17, %v722_v32  ;;  %v180_v32 = vmul.f32 %v162_v53, %v737_v42  ;;  %v877_v17 = vmul.f32 %v805_v51, %v737_v42 }
  0xb6   :  { %301 = vperm.xlu1 %583, %v679_v7   ;;  %v114_v6 = vadd.f32 %v89_v52, %v78_v11  ;;  %v313_v52 = vmul.f32 %v298_v21, %v765_v14  ;;  %v256_v11 = vadd.f32 %v240_v10, %v184_v58  ;;  %v172_v10 = vmul.f32 %v162_v53, %v733_v40 }
  0xb7   :  { %v815_v7 = vpop.permute.xlu0 %233  ;;  %v182_v58 = vmul.f32 %v807_v55, %v737_v42  ;;  %v196_v28 = vadd.f32 %v180_v32, %v118_v31  ;;  %v197_v42 = vadd.f32 %v181_v34, %v119_v9 }
  0xb8   :  { %v192_v20 = vadd.f32 %v176_v3, %v114_v6  ;;  %v121_v3 = vadd.f32 %v104_v54, %v85_v49  ;;  %v849_v6 = vpop.permute.xlu1 %229  ;;  %v852_v8 = vadd.f32 %v312_v50, %v256_v11  ;;  %v854_v36 = vadd.f32 %v313_v52, %v257_v0 }
  0xb9   :  { %v173_v54 = vmul.f32 %v162_v53, %v735_v41  ;;  %v244_v19 = vmul.f32 %v815_v7, %v741_v45  ;;  %v885_v53 = vmul.f32 %v805_v51, %v739_v43  ;;  %v188_v26 = vadd.f32 %v172_v10, %v110_v4 }
  0xba   :  { %v264_v22 = vadd.f32 %v248_v18, %v192_v20  ;;  %v869_v18 = vadd.f32 %v321_v57, %v265_v1  ;;  %v356_v40 = vmax.f32 %v852_v8, 0.0  ;;  %v357_v20 = vmax.f32 %v854_v36, 0.0 }
  0xbb   :  { %v189_v27 = vadd.f32 %v173_v54, %v111_v5  ;;  %v252_v29 = vmul.f32 %v815_v7, %v745_v47  ;;  %v183_v51 = vmul.f32 %v807_v55, %v739_v43  ;;  %v190_v49 = vadd.f32 %v174_v12, %v112_v25 }
  0xbc   :  { %v856_v61 = vadd.f32 %v320_v59, %v264_v22  ;;  %v198_v52 = vadd.f32 %v182_v58, %v120_v2  ;;  %v245_v59 = vmul.f32 %v815_v7, %v743_v46  ;;  %v253_v11 = vmul.f32 %v815_v7, %v747_v48 }
  0xbd   :  { %v260_v0 = vadd.f32 %v244_v19, %v188_v26  ;;  %v268_v55 = vadd.f32 %v252_v29, %v196_v28  ;;  %v199_v54 = vadd.f32 %v183_v51, %v121_v3  ;;  %v191_v26 = vadd.f32 %v175_v44, %v844_v56 }
  0xbe   :  { %v364_v21 = vmax.f32 %v856_v61, 0.0  ;;  %v261_v32 = vadd.f32 %v245_v59, %v189_v27  ;;  %v269_v34 = vadd.f32 %v253_v11, %v197_v42  ;;  %v365_v59 = vmax.f32 %v869_v18, 0.0 }
  0xbf   :  { %v834_v60 = vpop.permute.xlu0 %237  ;;  %v187_v36 = vadd.f32 %v873_v35, %v842_v24 }
  0xc0   :  { %v246_v25 = vmul.f32 %v834_v60, %v741_v45  ;;  %v247_v12 = vmul.f32 %v834_v60, %v743_v46 }
  0xc2   :  { %v262_v28 = vadd.f32 %v246_v25, %v190_v49  ;;  %v263_v51 = vadd.f32 %v247_v12, %v191_v26 }
  0xc8   :  { %v306_v50 = vpop.permute.xlu0 %305 }
  0xc9   :  { %v316_v2 = vmul.f32 %v306_v50, %v763_v13  ;;  %v324_v5 = vmul.f32 %v306_v50, %v767_v15  ;;  %v325_v7 = vmul.f32 %v306_v50, %v769_v16 }
  0xcb   :  { %v332_v58 = vadd.f32 %v316_v2, %v260_v0  ;;  %v340_v19 = vadd.f32 %v324_v5, %v268_v55  ;;  %v341_v29 = vadd.f32 %v325_v7, %v269_v34 }
  0xcd   :  { %v360_v56 = vmax.f32 %v332_v58, 0.0  ;;  %v368_v44 = vmax.f32 %v340_v19, 0.0 }
 0x10f   :  { %v415_v22 = vpop.xlane.xlu2 %414 }
 0x110   :  { %v412_v57 = vpop.xlane.xlu1 %411  ;;  %v418_v1 = vsub.f32 %v791_v30, %v415_v22  ;;  %v419_v4 = vsub.f32 %v793_v37, %v415_v22  ;;  %v254_v30 = vmul.f32 %v834_v60, %v745_v47  ;;  %v255_v37 = vmul.f32 %v834_v60, %v747_v48 }
 0x111   :  { %v416_v41 = vsub.f32 %v795_v38, %v412_v57  ;;  %v417_v43 = vsub.f32 %v797_v39, %v412_v57  ;;  %v317_v38 = vmul.f32 %v306_v50, %v765_v14 }
 0x112   :  { %v424_v31 = vmul.f32 1.442695, %v418_v1  ;;  %v426_v9 = vmul.f32 1.442695, %v419_v4  ;;  %v270_v22 = vadd.f32 %v254_v30, %v198_v52  ;;  %v271_v57 = vadd.f32 %v255_v37, %v199_v54 }
 0x113   :  { %v420_v10 = vmul.f32 1.442695, %v416_v41  ;;  %v422_v39 = vmul.f32 1.442695, %v417_v43  ;;  %v333_v1 = vadd.f32 %v317_v38, %v261_v32  ;;  %v369_v52 = vmax.f32 %v341_v29, 0.0 }
 0x114   :  { %586 = vpow2.f32 %v424_v31 }
 0x115   :  { %588 = vpow2.f32 %v426_v9  ;;  %v361_v55 = vmax.f32 %v333_v1, 0.0  ;;  %v243_v1 = vmul.f32 %v849_v6, %v743_v46 }
 0x116   :  { %590 = vpow2.f32 %v420_v10 }
 0x117   :  { %592 = vpow2.f32 %v422_v39  ;;  %v310_v50 = vpop.permute.xlu2 %309 }
 0x118   :  { %v318_v3 = vmul.f32 %v310_v50, %v763_v13  ;;  %v319_v27 = vmul.f32 %v310_v50, %v765_v14  ;;  %v326_v42 = vmul.f32 %v310_v50, %v767_v15  ;;  %v327_v60 = vmul.f32 %v310_v50, %v769_v16 }
 0x119   :  { %v242_v50 = vmul.f32 %v849_v6, %v741_v45 }
 0x11a   :  { %v922_v49 = vpop.eup %586  ;;  %v342_v11 = vadd.f32 %v326_v42, %v270_v22  ;;  %v343_v0 = vadd.f32 %v327_v60, %v271_v57  ;;  %v334_v4 = vadd.f32 %v318_v3, %v262_v28  ;;  %v335_v2 = vadd.f32 %v319_v27, %v263_v51 }
 0x11b   :  { %v924_v41 = vpop.eup %588  ;;  %v442_v43 = vmul.f32 %v922_v49, %v364_v21  ;;  %v446_v25 = vmul.f32 %v922_v49, %v368_v44  ;;  %v186_v28 = vadd.f32 %v864_v33, %v838_v23  ;;  %v195_v57 = vadd.f32 %v885_v53, %v789_v63 }
 0x11c   :  { %v591_v5 = vpop.eup %590  ;;  %v431_v18 = vadd.f32 %v924_v41, %v922_v49  ;;  %v443_v7 = vmul.f32 %v924_v41, %v365_v59  ;;  %v447_v31 = vmul.f32 %v924_v41, %v369_v52  ;;  %v370_v9 = vmax.f32 %v342_v11, 0.0 }
 0x11d   :  { %v593_v10 = vpop.eup %592  ;;  %v434_v30 = vmul.f32 %v591_v5, %v356_v40  ;;  %v438_v61 = vmul.f32 %v591_v5, %v360_v56  ;;  %v371_v37 = vmax.f32 %v343_v0, 0.0  ;;  %v362_v21 = vmax.f32 %v334_v4, 0.0 }
 0x11e   :  { %432 = vadd.xlane.f32.xlu2 %v431_v18  ;;  %v428_v38 = vadd.f32 %v593_v10, %v591_v5  ;;  %v435_v39 = vmul.f32 %v593_v10, %v357_v20  ;;  %v462_v54 = vadd.f32 %v443_v7, %v442_v43  ;;  %v439_v32 = vmul.f32 %v593_v10, %v361_v55 }
 0x11f   :  { %v468_v34 = vadd.f32 %v447_v31, %v446_v25  ;;  %v448_v12 = vmul.f32 %v922_v49, %v370_v9  ;;  %v449_v58 = vmul.f32 %v924_v41, %v371_v37  ;;  %v363_v19 = vmax.f32 %v335_v2, 0.0 }
 0x120   :  { %429 = vadd.xlane.f32.xlu1 %v428_v38  ;;  %v450_v26 = vadd.f32 %v435_v39, %v434_v30  ;;  %v456_v8 = vadd.f32 %v439_v32, %v438_v61  ;;  %v440_v40 = vmul.f32 %v591_v5, %v362_v21  ;;  %v194_v20 = vadd.f32 %v877_v17, %v786_v62 }
 0x121   :  { %v471_v29 = vadd.f32 %v449_v58, %v448_v12  ;;  %v441_v22 = vmul.f32 %v593_v10, %v363_v19  ;;  %v250_v23 = vmul.f32 %v849_v6, %v745_v47  ;;  %v251_v33 = vmul.f32 %v849_v6, %v747_v48 }
 0x122   :  { %451 = vadd.xlane.f32.xlu0 %v450_v26  ;;  %v258_v35 = vadd.f32 %v242_v50, %v186_v28  ;;  %v259_v62 = vadd.f32 %v243_v1, %v187_v36  ;;  %v522_v32 = vlaneseq }
 0x123   :  { %v459_v24 = vadd.f32 %v441_v22, %v440_v40  ;;  %v266_v17 = vadd.f32 %v250_v23, %v194_v20  ;;  %v267_v3 = vadd.f32 %v251_v33, %v195_v57 }
 0x126   :  { %463 = vadd.xlane.f32.xlu2 %v462_v54 }
 0x128   :  { %v302_v63 = vpop.permute.xlu1 %301 }
 0x129   :  { %v314_v53 = vmul.f32 %v302_v63, %v763_v13  ;;  %v315_v45 = vmul.f32 %v302_v63, %v765_v14  ;;  %v322_v27 = vmul.f32 %v302_v63, %v767_v15  ;;  %v323_v46 = vmul.f32 %v302_v63, %v769_v16 }
 0x12a   :  { %457 = vadd.xlane.f32.xlu0 %v456_v8  ;;  %v523_v8 = vand.u32 127, %v522_v32 }
 0x12b   :  { %v330_v47 = vadd.f32 %v314_v53, %v258_v35  ;;  %v331_v42 = vadd.f32 %v315_v45, %v259_v62  ;;  %v338_v60 = vadd.f32 %v322_v27, %v266_v17  ;;  %v339_v48 = vadd.f32 %v323_v46, %v267_v3 }
 0x12c   :  { %v525_v22 = vadd.s32 4294967288, %v523_v8  ;;  %v529_v23 = vadd.s32 4294967280, %v523_v8  ;;  %v533_v63 = vadd.s32 4294967272, %v523_v8 }
 0x12d   :  { %v358_v6 = vmax.f32 %v330_v47, 0.0  ;;  %v359_v51 = vmax.f32 %v331_v42, 0.0  ;;  %v366_v59 = vmax.f32 %v338_v60, 0.0  ;;  %v367_v56 = vmax.f32 %v339_v48, 0.0 }
 0x12e   :  { %469 = vadd.xlane.f32.xlu2 %v468_v34 }
 0x12f   :  { %v436_v44 = vmul.f32 %v591_v5, %v358_v6  ;;  %v437_v52 = vmul.f32 %v593_v10, %v359_v51  ;;  %v444_v13 = vmul.f32 %v922_v49, %v366_v59  ;;  %v445_v14 = vmul.f32 %v924_v41, %v367_v56 }
 0x131   :  { %v453_v11 = vadd.f32 %v437_v52, %v436_v44  ;;  %v465_v15 = vadd.f32 %v445_v14, %v444_v13 }
 0x132   :  { %472 = vadd.xlane.f32.xlu0 %v471_v29 }
 0x133   :  { %454 = vadd.xlane.f32.xlu1 %v453_v11 }
 0x13b   :  { %466 = vadd.xlane.f32.xlu1 %v465_v15 }
 0x143   :  { %460 = vadd.xlane.f32.xlu1 %v459_v24 }
 0x191   :  { %v433_v16 = vpop.xlane.xlu2 %432 }
 0x192   :  { %v475_v0 = vmul.f32 256.0, %v433_v16 }
 0x193   :  { %v430_v4 = vpop.xlane.xlu1 %429 }
 0x194   :  { %594 = vrcp.f32 %v475_v0  ;;  %v474_v43 = vmul.f32 256.0, %v430_v4  ;;  %v502_v10 = vand.u32 2147483648, %v475_v0  ;;  %vm496_vm2 = vweird.f32 %v475_v0 }
 0x195   :  { %v452_v49 = vpop.xlane.xlu0 %451  ;;  %v500_v37 = vand.u32 2147483647, %v475_v0 }
 0x196   :  { %596 = vrcp.f32 %v474_v43  ;;  %v487_v38 = vand.u32 2147483648, %v474_v43  ;;  %vm481_vm4 = vweird.f32 %v474_v43  ;;  %v485_v54 = vand.u32 2147483647, %v474_v43 }
 0x197   :  { %v503_v12 = vor.u32 1.1754944e-38, %v502_v10  ;;  %vm501_vm6 = vcmp.eq.f32.partialorder %v500_v37, 8.507059e+37 }
 0x198   :  { %v488_v19 = vor.u32 1.1754944e-38, %v487_v38  ;;  %vm486_vm7 = vcmp.eq.f32.partialorder %v485_v54, 8.507059e+37 }
 0x199   :  { %v464_v21 = vpop.xlane.xlu2 %463 }
 0x19a   :  { %v595_v55 = vpop.eup %594 }
 0x19b   :  { %v492_v25 = vmul.f32 %v595_v55, %v475_v0  ;;  %vm497_vm0 = vweird.f32 %v595_v55 }
 0x19c   :  { %v597_v2 = vpop.eup %596  ;;  %vm498_vm3 = vmor %vm496_vm2, %vm497_vm0 }
 0x19d   :  { %v493_v5 = vsub.f32 1.0, %v492_v25  ;;  %v477_v18 = vmul.f32 %v597_v2, %v474_v43  ;;  %vm482_vm1 = vweird.f32 %v597_v2  ;;  %v458_v39 = vpop.xlane.xlu0 %457 }
 0x19e   :  { %vm483_vm5 = vmor %vm481_vm4, %vm482_vm1 }
 0x19f   :  { %v478_v7 = vsub.f32 1.0, %v477_v18  ;;  %v494_v41 = vmul.f32 %v595_v55, %v493_v5 }
 0x1a1   :  { %v479_v31 = vmul.f32 %v597_v2, %v478_v7  ;;  %v495_v9 = vadd.f32 %v595_v55, %v494_v41  ;;  %v470_v50 = vpop.xlane.xlu2 %469 }
 0x1a3   :  { %v480_v61 = vadd.f32 %v597_v2, %v479_v31  ;;  %v499_v34 = vsel %vm498_vm3, %v595_v55, %v495_v9 }
 0x1a4   :  { %v504_v26 = vsel %vm501_vm6, %v503_v12, %v499_v34 }
 0x1a5   :  { %v484_v58 = vsel %vm483_vm5, %v597_v2, %v480_v61  ;;  %v510_v29 = vmul.f32 %v504_v26, %v464_v21  ;;  %v512_v33 = vmul.f32 %v504_v26, %v470_v50  ;;  %v473_v24 = vpop.xlane.xlu0 %472 }
 0x1a6   :  { %v455_v30 = vpop.xlane.xlu1 %454  ;;  %v489_v40 = vsel %vm486_vm7, %v488_v19, %v484_v58  ;;  %v513_v53 = vmul.f32 %v504_v26, %v473_v24 }
 0x1a7   :  { %v507_v36 = vmul.f32 %v489_v40, %v455_v30  ;;  %v506_v57 = vmul.f32 %v489_v40, %v452_v49  ;;  %v537_v35 = vperm.slane %v510_v29, %v523_v8  ;;  %v508_v17 = vmul.f32 %v489_v40, %v458_v39 }
 0x1a8   :  { %v540_v27 = vperm.slane %v512_v33, %v529_v23  ;;  %v542_v6 = vperm.slane %v513_v53, %v533_v63 }
 0x1a9   :  { %v526_v62 = vperm.slane %v507_v36, %v525_v22  ;;  %v524_v3 = vperm.slane %v506_v57, %v523_v8  ;;  %v530_v60 = vperm.slane %v508_v17, %v529_v23 }
 0x1ab   :  { %v528_v47 = vsel %vm527_vm8, %v526_v62, %v524_v3 }
 0x1ac   :  { %v532_v59 = vsel %vm531_vm9, %v530_v60, %v528_v47 }
 0x1ae   :  { %v467_v28 = vpop.xlane.xlu1 %466 }
 0x1af   :  { %v511_v20 = vmul.f32 %v504_v26, %v467_v28 }
 0x1b1   :  { %v538_v1 = vperm.slane %v511_v20, %v525_v22 }
 0x1b3   :  { %v539_v45 = vsel %vm527_vm8, %v538_v1, %v537_v35 }
 0x1b4   :  { %v541_v48 = vsel %vm531_vm9, %v540_v27, %v539_v45 }
 0x1b5   :  { %v543_v44 = vsel %vm535_vm10, %v542_v6, %v541_v48 }
 0x1b6   :  { %v461_v46 = vpop.xlane.xlu1 %460 }
 0x1b7   :  { %v509_v42 = vmul.f32 %v489_v40, %v461_v46 }
 0x1b9   :  { %v534_v51 = vperm.slane %v509_v42, %v533_v63 }
 0x1bb   :  { %v536_v56 = vsel %vm535_vm10, %v534_v51, %v532_v59 }
 0x1bc   :  { %v545_v52 = vsel %vm544_vm11, %v543_v44, %v536_v56 }
 0x1bd   :  { %548 = vst.msk [vmem:[#allocation2] sm:$0x3] %vm547_vm12, %v545_v52 }
 0x1be   :  { %559 = dma.vmem_to_hbm [thread:$0]  %s555_s18, 32, %s557_s21, [#allocation3]  }
 0x1bf   :  { %622 = dma.done.wait [#allocation3], 32  }
 0x1c0   :  { %623 = vsyncadd [#allocation3], 4294967264 }
 0x1c1   :  { %564 = vsyncpa [#allocation3], 1 }

</bundles_post_ra>
